<compile_context>
chip_gen: v6e
topology: v6e:2x2x1
jax: 0.10.0
libtpu: 0.0.40
codegen_flags: <defaults>
</compile_context>

<pallas_src>
import functools
import math

import jax
import jax.numpy as jnp
from jax.experimental import pallas as pl
from jax.experimental.pallas import tpu as pltpu


# --------------------------------------------------------------------------
# Kernel
# --------------------------------------------------------------------------
def _time2vec_kernel(t_ref, w_ref, b_ref, o_ref):
    """o[r, j] = t[r, 0] * w[0, j] + b[0, j]  (affine map of scalar time)."""
    t = t_ref[...].astype(jnp.float32)   # (TM, 1)
    w = w_ref[...].astype(jnp.float32)   # (1, D)
    b = b_ref[...].astype(jnp.float32)   # (1, D)
    o_ref[...] = (t * w + b).astype(o_ref.dtype)


# --------------------------------------------------------------------------
# Host-side glue
# --------------------------------------------------------------------------
def _choose_block_rows(n_rows, d):
    """Biggest row-block that keeps one f32 output tile <= ~2 MiB (x2 buffers)."""
    max_rows_by_vmem = max(8, (((2 * 1024 * 1024) // (d * 4)) // 8) * 8)
    tm = min(2048, max_rows_by_vmem)
    if n_rows < tm:
        tm = max(8, ((n_rows + 7) // 8) * 8)
    return tm


@jax.jit
def time2vec_apply(t, w_lin, b_lin, w_cos, b_cos):
    """Pallas equivalent of Time2vec.forward.

    t:      [..., 1]
    w_lin:  (half, 1), b_lin: (half,)   -- nn.Linear(1, half) parameters
    w_cos:  (half, 1), b_cos: (half,)
    returns [..., 2*half] = cat([t @ w_lin.T + b_lin, t @ w_cos.T + b_cos], -1)
    """
    lead = t.shape[:-1]
    n = math.prod(lead) if lead else 1
    half = w_lin.shape[0]
    d = 2 * half
    out_dtype = t.dtype

    # Fuse the two Linear(1, half) layers into one [1 -> d] affine map.
    w = jnp.concatenate([w_lin.reshape(-1), w_cos.reshape(-1)]).reshape(1, d)
    b = jnp.concatenate([b_lin.reshape(-1), b_cos.reshape(-1)]).reshape(1, d)

    tm = _choose_block_rows(n, d)
    n_pad = ((n + tm - 1) // tm) * tm

    t2d = t.reshape(n, 1)
    if n_pad != n:
        # Only the tiny scalar-time column gets padded (1 element per row); the
        # padded output rows are sliced off once below.
        # TODO(synk): mask the ragged tail in-kernel to avoid the output slice.
        t2d = jnp.pad(t2d, ((0, n_pad - n), (0, 0)))

    out = pl.pallas_call(
        _time2vec_kernel,
        out_shape=jax.ShapeDtypeStruct((n_pad, d), out_dtype),
        grid_spec=pltpu.PrefetchScalarGridSpec(
            num_scalar_prefetch=0,
            grid=(n_pad // tm,),
            in_specs=[
                pl.BlockSpec((tm, 1), lambda i: (i, 0)),   # time column
                pl.BlockSpec((1, d), lambda i: (0, 0)),    # fused weights
                pl.BlockSpec((1, d), lambda i: (0, 0)),    # fused biases
            ],
            out_specs=pl.BlockSpec((tm, d), lambda i: (i, 0)),
        ),
        compiler_params=pltpu.CompilerParams(
            dimension_semantics=("parallel",)),   # megacore-shardable on v7x
    )(t2d, w, b)

    if n_pad != n:
        out = out[:n]
    return out.reshape(*lead, d)


# --------------------------------------------------------------------------
# Demo / self-test
# --------------------------------------------------------------------------
if __name__ == "__main__":
    key = jax.random.PRNGKey(0)
    k1, k2, k3, k4, k5 = jax.random.split(key, 5)

    temporal_dim = 32
    half = temporal_dim // 2
    batch, seq = 2, 8

    # Time input [..., 1] plus the two Linear(1, half) parameter sets.
    t = jax.random.normal(k1, (batch, seq, 1), dtype=jnp.float32)
    w_lin = jax.random.normal(k2, (half, 1), dtype=jnp.float32) * 0.1
    b_lin = jax.random.normal(k3, (half,), dtype=jnp.float32) * 0.1
    w_cos = jax.random.normal(k4, (half, 1), dtype=jnp.float32) * 0.1
    b_cos = jax.random.normal(k5, (half,), dtype=jnp.float32) * 0.1

    out = time2vec_apply(t, w_lin, b_lin, w_cos, b_cos)
    jax.block_until_ready(out)

    # Reference (plain JAX == PyTorch Time2vec.forward semantics).
    ta = t @ w_lin.T + b_lin
    tb = t @ w_cos.T + b_cos
    ref = jnp.concatenate([ta, tb], axis=-1)

    assert out.shape == (batch, seq, temporal_dim), out.shape
    assert jnp.allclose(out, ref, rtol=1e-5, atol=1e-5)

    print("KERNEL_OK")
</pallas_src>

<mosaic_0001>
module attributes {stable_mosaic.version = 11 : i64} {
  func.func @_time2vec_kernel(%arg0: i32, %arg1: memref<16x1xf32, #tpu.memory_space<vmem>>, %arg2: memref<1x32xf32, #tpu.memory_space<vmem>>, %arg3: memref<1x32xf32, #tpu.memory_space<vmem>>, %arg4: memref<16x32xf32, #tpu.memory_space<vmem>>) attributes {dimension_semantics = [#tpu.dimension_semantics<parallel>], iteration_bounds = array<i64: 1>, scalar_prefetch = 0 : i64, scratch_operands = 0 : i64, tpu.core_type = #tpu.core_type<tc>, window_params = [{transform_indices = @transform_0, window_bounds = array<i64: 16, 1>}, {pipeline_mode = #tpu.pipeline_mode<synchronous>, transform_indices = @transform_1, window_bounds = array<i64: 1, 32>}, {pipeline_mode = #tpu.pipeline_mode<synchronous>, transform_indices = @transform_2, window_bounds = array<i64: 1, 32>}, {transform_indices = @transform_3, window_bounds = array<i64: 16, 32>}]} {
    %c0 = arith.constant 0 : index
    %c0_0 = arith.constant 0 : index
    %0 = vector.load %arg1[%c0, %c0_0] : memref<16x1xf32, #tpu.memory_space<vmem>>, vector<16x1xf32>
    %c0_1 = arith.constant 0 : index
    %c0_2 = arith.constant 0 : index
    %1 = vector.load %arg2[%c0_1, %c0_2] : memref<1x32xf32, #tpu.memory_space<vmem>>, vector<1x32xf32>
    %c0_3 = arith.constant 0 : index
    %c0_4 = arith.constant 0 : index
    %2 = vector.load %arg3[%c0_3, %c0_4] : memref<1x32xf32, #tpu.memory_space<vmem>>, vector<1x32xf32>
    %3 = vector.broadcast %0 : vector<16x1xf32> to vector<16x32xf32>
    %4 = vector.broadcast %1 : vector<1x32xf32> to vector<16x32xf32>
    %5 = arith.mulf %3, %4 : vector<16x32xf32>
    %6 = vector.broadcast %2 : vector<1x32xf32> to vector<16x32xf32>
    %7 = arith.addf %5, %6 : vector<16x32xf32>
    %c0_5 = arith.constant 0 : index
    %c0_6 = arith.constant 0 : index
    %8 = vector.load %arg4[%c0_5, %c0_6] : memref<16x32xf32, #tpu.memory_space<vmem>>, vector<16x32xf32>
    tpu.vector_store %arg4[%c0_5, %c0_6], %7 {strides = array<i32>} : memref<16x32xf32, #tpu.memory_space<vmem>>, vector<16x32xf32>,
    return
  }
  func.func @transform_0(%arg0: i32) -> (i32, i32) {
    %c0_i32 = arith.constant 0 : i32
    %c0_i32_0 = arith.constant 0 : i32
    return %arg0, %c0_i32 : i32, i32
  }
  func.func @transform_1(%arg0: i32) -> (i32, i32) {
    %c0_i32 = arith.constant 0 : i32
    %c0_i32_0 = arith.constant 0 : i32
    %c0_i32_1 = arith.constant 0 : i32
    return %c0_i32, %c0_i32_0 : i32, i32
  }
  func.func @transform_2(%arg0: i32) -> (i32, i32) {
    %c0_i32 = arith.constant 0 : i32
    %c0_i32_0 = arith.constant 0 : i32
    %c0_i32_1 = arith.constant 0 : i32
    return %c0_i32, %c0_i32_0 : i32, i32
  }
  func.func @transform_3(%arg0: i32) -> (i32, i32) {
    %c0_i32 = arith.constant 0 : i32
    %c0_i32_0 = arith.constant 0 : i32
    return %arg0, %c0_i32 : i32, i32
  }
}

</mosaic_0001>

<bundles_post_ra>
// kernel: time2vec_apply.1
= control target key start
LH: loop header
LB: loop body
LE: loop exit
PB: predicated region body
PF: predicated region fallthrough
CT: control target
= control target key end

     0   :  { %v93_v1 = vmov 0   ;;  %s132_s0 = inlined_call_operand.vmem [shape: f32[16,1], index: 0, kind: input, shape index: {}]   ;;  %s133_s1 = inlined_call_operand.vmem [shape: f32[1,32], index: 1, kind: input, shape index: {}]   ;;  %s134_s2 = inlined_call_operand.vmem [shape: f32[1,32], index: 2, kind: input, shape index: {}]   ;;  %s135_s3 = inlined_call_operand.hbm [shape: f32[16,32], index: 3, kind: output, shape index: {}]  }
   0x1   :  { %v15_v0 = vld [vmem:[%s132_s0] sm:$0xff]  ;;  %70 = vset.pattern.permute.xlu0 %v93_v1 }
   0x2   :  { %8 = vsyncpa [#allocation3], 0  ;;  %21 = vperm.xlu0 %70, %v15_v0   ;;  %v16_v2 = vld [vmem:[%s132_s0 + $0x8] sm:$0xff]  ;;  %v64_v3 = vld [vmem:[%s133_s1] ss:$0 sm:$0xff]  ;;  %vm45_vm0 = vcmask 261120  }
   0x3   :  { %v65_v4 = vld [vmem:[%s134_s2] ss:$0 sm:$0xff]  ;;  %s94_s20 = smov [#allocation2]  }
   0x4   :  { %s53_s21 = sshll.u32 %s94_s20, 4  ;;  %s54_s21 = int_to_ptr.vmem [resolvable:$true] %s53_s21 }
   0x5   :  { %s71_s0 = scalar_lea.vmem %s54_s21, 256  ;;  %p76_p1 = scmp.lt.s32.totalorder %s54_s21, %s54_s21 }
   0x6   :  { %26 = vperm.xlu0 %70, %v16_v2   ;;  %p72_p0 = scmp.ne.s32.totalorder %s54_s21, %s71_s0  ;;  %p77_p2 = scmp.lt.s32.totalorder %s71_s0, %s71_s0 }
   0x8   :  { %p78_p3 = por %p77_p2, %p76_p1 }
   0xa   :  { %p79_p4 = pnand %p78_p3, %p72_p0 }
  0x7d   :  { %v22_v5 = vpop.permute.xlu0 %21 }
  0x7e   :  { %v35_v6 = vmul.f32 %v64_v3, %v22_v5 }
  0x80   :  { %v43_v7 = vadd.f32 %v65_v4, %v35_v6 }
  0x81   :  { %v27_v8 = vpop.permute.xlu0 %26 }
  0x82   :  { %46 = vst.msk [vmem:[#allocation2] sm:$0xff] %vm45_vm0, %v43_v7  ;;  %v36_v9 = vmul.f32 %v64_v3, %v27_v8 }
  0x84   :  { %v44_v10 = vadd.f32 %v65_v4, %v36_v9 }
  0x86   :  { %47 = vst.msk [vmem:[#allocation2 + $0x8] sm:$0xff] %vm45_vm0, %v44_v10 }
  0x87   :  { %82 = shalt.err (!%p79_p4)
}
  0x88   :  { %s95_s1 = smov 128   ;;  %s96_s2 = smov 8  }
  0x89   :  { %59 = dma.vmem_to_hbm [thread:$0]  %s54_s21, 256, %s135_s3, [#allocation3], %s95_s1, %s95_s1, %s96_s2  }
  0x8a   :  { %91 = dma.done.wait [#allocation3], 256  }
  0x8b   :  { %92 = vsyncadd [#allocation3], 4294967040 }
  0x8c   :  { %63 = vsyncpa [#allocation3], 1 }

</bundles_post_ra>
